<compile_context>
chip_gen: v5e
topology: v5e:2x2
jax: 0.10.0
libtpu: 0.0.40
codegen_flags: <defaults>
</compile_context>

<pallas_src>
import math

import jax
import jax.numpy as jnp
from jax import lax
from jax.experimental import pallas as pl
from jax.experimental.pallas import tpu as pltpu


def _elu(x):
    # ELU with alpha=1.0 (F.elu default).  exp(x)-1 == expm1(x) to f32 noise for x<=0.
    return jnp.where(x > 0, x, jnp.exp(x) - 1.0)


def _round_up(v, m):
    return ((v + m - 1) // m) * m


def _vmem_capacity_bytes():
    try:
        return int(pltpu.get_tpu_info().vmem_capacity_bytes)
    except Exception:
        return 64 << 20            # conservative default (v7x per-TensorCore VMEM)


def mlp_forward(x, w1, b1, w2, b2, gamma, beta, *, mxu_dtype=jnp.bfloat16):
    """x: (B, N, n_in) f32.  Weights stored transposed: w1 (n_in, n_hid),
    w2 (n_hid, n_out).  Returns (B, N, n_out) f32 (training-mode BatchNorm)."""
    B, N, n_in = x.shape
    n_hid = w1.shape[1]
    n_out = w2.shape[1]
    M = B * N

    f32 = jnp.float32
    exact_f32 = jnp.dtype(mxu_dtype) == jnp.dtype(f32)
    y_dtype = f32 if exact_f32 else jnp.bfloat16       # stored-intermediate dtype
    y_bytes = jnp.dtype(y_dtype).itemsize

    # ---- generation-aware VMEM budget / row-tile sizing ----------------------
    vmem_cap = _vmem_capacity_bytes()
    vmem_limit = int(min(vmem_cap * 3 // 4, 96 << 20))  # <= 48 MiB on v7x (64 MiB VMEM)
    tm_target = 1024 if vmem_cap >= (100 << 20) else 512

    w_bytes = (n_in * n_hid + n_hid * n_out + n_hid + n_out) * 4

    def tile_bytes(tm):
        streams = 2 * tm * (n_in * 4 + n_out * y_bytes) * 2      # double-buffered x/y
        scratch = tm * (_round_up(n_hid, 128) + 2 * _round_up(n_out, 128)) * 4
        return streams + scratch

    TM = min(tm_target, _round_up(M, 8))
    if M > 8:                       # >= 2 row tiles so both v7x TensorCores get work
        TM = min(TM, _round_up((M + 1) // 2, 8))
    while TM > 8 and tile_bytes(TM) + 2 * w_bytes > vmem_limit // 2:
        TM //= 2
    TM = max(8, (TM // 8) * 8)
    M_pad = _round_up(M, TM)
    num_tiles = M_pad // TM
    # TODO(synk): if n_hid/n_out grow so large that resident weights exceed the VMEM
    # budget, add a K/N grid axis that tiles w1/w2 instead of keeping them resident.

    # ---- inputs: rows zero-padded to a multiple of TM; NO feature padding ----
    xp = jnp.pad(x.reshape(M, n_in).astype(f32), ((0, M_pad - M), (0, 0)))
    w1f = w1.astype(f32)
    w2f = w2.astype(f32)
    b1_2d = b1.reshape(1, n_hid).astype(f32)
    b2_2d = b2.reshape(1, n_out).astype(f32)

    # ============ fused MLP kernel: y = ELU(fc2(ELU(fc1(x)))) + BN partials ===
    def kernel(x_ref, w1_ref, b1_ref, w2_ref, b2_ref, y_ref, part_ref):
        i = pl.program_id(0)
        x_t = x_ref[...].astype(mxu_dtype)                               # (TM, n_in)
        h = jnp.dot(x_t, w1_ref[...].astype(mxu_dtype),
                    preferred_element_type=f32) + b1_ref[...]
        h = _elu(h)
        # TODO(synk): do_prob > 0 would need an in-kernel dropout mask via
        # pltpu.prng_seed / pltpu.prng_random_bits; module default p=0.0 -> identity.
        y = jnp.dot(h.astype(mxu_dtype), w2_ref[...].astype(mxu_dtype),
                    preferred_element_type=f32) + b2_ref[...]
        y = _elu(y)                                                      # (TM, n_out) f32
        y_ref[...] = y.astype(y_ref.dtype)

        # BatchNorm partial sums from the f32 value (mask rows that are M-padding).
        row = i * TM + lax.broadcasted_iota(jnp.int32, (TM, 1), 0)
        ym = jnp.where(row < M, y, 0.0)
        s = jnp.sum(ym, axis=0, keepdims=True)                           # (1, n_out)
        ss = jnp.sum(ym * ym, axis=0, keepdims=True)                     # (1, n_out)
        part_ref[...] = jnp.concatenate([s, ss], axis=0)                 # (2, n_out)

    flops = 2 * M_pad * (n_in * n_hid + n_hid * n_out)
    trans = M_pad * (n_hid + n_out)
    bytes_accessed = (M_pad * n_in * 4 + w_bytes
                      + M_pad * n_out * y_bytes + num_tiles * 2 * n_out * 4)

    def run(single_buffer_weights):
        def const_spec(shape):
            idx = lambda i: (0,) * len(shape)
            if single_buffer_weights:
                return pl.BlockSpec(shape, idx, pipeline_mode=pl.Buffered(1))
            return pl.BlockSpec(shape, idx)

        grid_spec = pltpu.PrefetchScalarGridSpec(
            num_scalar_prefetch=0,
            grid=(num_tiles,),
            in_specs=[
                pl.BlockSpec((TM, n_in), lambda i: (i, 0)),        # x: streamed
                const_spec((n_in, n_hid)),                         # weights: resident
                const_spec((1, n_hid)),
                const_spec((n_hid, n_out)),
                const_spec((1, n_out)),
            ],
            out_specs=[
                pl.BlockSpec((TM, n_out), lambda i: (i, 0)),       # y: streamed
                pl.BlockSpec((None, 2, n_out), lambda i: (i, 0, 0)),
            ],
        )
        return pl.pallas_call(
            kernel,
            out_shape=(jax.ShapeDtypeStruct((M_pad, n_out), y_dtype),
                       jax.ShapeDtypeStruct((num_tiles, 2, n_out), f32)),
            grid_spec=grid_spec,
            compiler_params=pltpu.CompilerParams(
                dimension_semantics=("parallel",),
                vmem_limit_bytes=vmem_limit,
            ),
            cost_estimate=pl.CostEstimate(flops=int(flops),
                                          transcendentals=int(trans),
                                          bytes_accessed=int(bytes_accessed)),
        )(xp, w1f, b1_2d, w2f, b2_2d)

    try:
        y_full, part = run(True)
    except Exception:
        # pipeline_mode=pl.Buffered(1) not supported on this jax version; default buffering.
        y_full, part = run(False)

    # ---- tiny XLA epilogue: cross-tile reduce + BN affine (fuses with slice) ---
    ssum = jnp.sum(part[:, 0, :], axis=0)                    # (n_out,)
    ssq = jnp.sum(part[:, 1, :], axis=0)
    mean = ssum / M
    var = jnp.maximum(ssq / M - mean * mean, 0.0)            # biased batch variance
    inv_std = lax.rsqrt(var + 1e-5)
    scale = gamma.astype(f32) * inv_std
    shift = beta.astype(f32) - mean * scale
    out = y_full[:M].astype(f32) * scale + shift             # fuses with slice/reshape
    return out.reshape(B, N, n_out)


def init_params(key, n_in, n_hid, n_out):
    """Deterministic init matching MLP.init_weights():
       Linear: xavier_normal_ weights, bias = 0.1; BatchNorm: gamma=1, beta=0."""
    k1, k2 = jax.random.split(key, 2)

    def xavier_normal(k, fan_in, fan_out):
        std = math.sqrt(2.0 / (fan_in + fan_out))
        return std * jax.random.normal(k, (fan_in, fan_out), dtype=jnp.float32)

    w1 = xavier_normal(k1, n_in, n_hid)                # stored transposed (fan_in, fan_out)
    b1 = jnp.full((n_hid,), 0.1, dtype=jnp.float32)
    w2 = xavier_normal(k2, n_hid, n_out)
    b2 = jnp.full((n_out,), 0.1, dtype=jnp.float32)
    gamma = jnp.ones((n_out,), dtype=jnp.float32)
    beta = jnp.zeros((n_out,), dtype=jnp.float32)
    return w1, b1, w2, b2, gamma, beta


def mlp_reference(x, w1, b1, w2, b2, gamma, beta, *,
                  mxu_dtype=jnp.float32, y_dtype=jnp.float32):
    """Pure-JAX reference.  mxu_dtype mirrors the kernel's matmul operand dtype,
    y_dtype mirrors the kernel's stored-intermediate dtype."""
    B, N, n_in = x.shape
    hp = lax.Precision.HIGHEST
    x2 = x.reshape(B * N, n_in).astype(mxu_dtype)
    h = _elu(jnp.dot(x2, w1.astype(mxu_dtype),
                     preferred_element_type=jnp.float32, precision=hp) + b1)
    y = _elu(jnp.dot(h.astype(mxu_dtype), w2.astype(mxu_dtype),
                     preferred_element_type=jnp.float32, precision=hp) + b2)
    mean = jnp.mean(y, axis=0, keepdims=True)
    var = jnp.mean((y - mean) ** 2, axis=0, keepdims=True)
    yq = y.astype(y_dtype).astype(jnp.float32)           # stored-intermediate rounding
    out = (yq - mean) / jnp.sqrt(var + 1e-5) * gamma + beta
    return out.reshape(B, N, -1)


if __name__ == "__main__":
    B, N = 2, 8                    # batch, num_atoms (folded together for BatchNorm1d)
    n_in, n_hid, n_out = 16, 32, 16

    key = jax.random.PRNGKey(0)
    kx, kp = jax.random.split(key)
    x = jax.random.normal(kx, (B, N, n_in), dtype=jnp.float32)
    params = init_params(kp, n_in, n_hid, n_out)

    # default fast path: bf16 MXU operands + bf16 stored intermediate
    out = jax.block_until_ready(mlp_forward(x, *params))
    assert out.shape == (B, N, n_out)
    assert not bool(jnp.any(jnp.isnan(out))), "NaNs in kernel output"

    ref_bf16 = mlp_reference(x, *params, mxu_dtype=jnp.bfloat16, y_dtype=jnp.bfloat16)
    assert jnp.allclose(out, ref_bf16, atol=5e-2, rtol=5e-2), \
        "mismatch vs matched (bf16) reference"

    ref_f32 = mlp_reference(x, *params)
    assert jnp.allclose(out, ref_f32, atol=1e-1, rtol=1e-1), \
        "bf16 path drifted too far from f32 semantics"

    # parity path: f32 MXU operands + f32 stored intermediate
    out_f32 = jax.block_until_ready(mlp_forward(x, *params, mxu_dtype=jnp.float32))
    assert jnp.allclose(out_f32, ref_f32, atol=1e-3, rtol=1e-3), \
        "mismatch vs f32 reference"

    print("KERNEL_OK")
</pallas_src>

<mosaic_0001>
module attributes {stable_mosaic.version = 11 : i64} {
  func.func @kernel(%arg0: i32, %arg1: memref<8x16xf32, #tpu.memory_space<vmem>>, %arg2: memref<16x32xf32, #tpu.memory_space<vmem>>, %arg3: memref<1x32xf32, #tpu.memory_space<vmem>>, %arg4: memref<32x16xf32, #tpu.memory_space<vmem>>, %arg5: memref<1x16xf32, #tpu.memory_space<vmem>>, %arg6: memref<8x16xbf16, #tpu.memory_space<vmem>>, %arg7: memref<1x2x16xf32, #tpu.memory_space<vmem>>) attributes {dimension_semantics = [#tpu.dimension_semantics<parallel>], iteration_bounds = array<i64: 2>, scalar_prefetch = 0 : i64, scratch_operands = 0 : i64, tpu.core_type = #tpu.core_type<tc>, window_params = [{transform_indices = @transform_0, window_bounds = array<i64: 8, 16>}, {pipeline_mode = #tpu.pipeline_mode<synchronous>, transform_indices = @transform_1, window_bounds = array<i64: 16, 32>}, {pipeline_mode = #tpu.pipeline_mode<synchronous>, transform_indices = @transform_2, window_bounds = array<i64: 1, 32>}, {pipeline_mode = #tpu.pipeline_mode<synchronous>, transform_indices = @transform_3, window_bounds = array<i64: 32, 16>}, {pipeline_mode = #tpu.pipeline_mode<synchronous>, transform_indices = @transform_4, window_bounds = array<i64: 1, 16>}, {transform_indices = @transform_5, window_bounds = array<i64: 8, 16>}, {transform_indices = @transform_6, window_bounds = array<i64: 1, 2, 16>}]} {
    %c0 = arith.constant 0 : index
    %c0_0 = arith.constant 0 : index
    %0 = vector.load %arg1[%c0, %c0_0] : memref<8x16xf32, #tpu.memory_space<vmem>>, vector<8x16xf32>
    %1 = arith.truncf %0 : vector<8x16xf32> to vector<8x16xbf16>
    %c0_1 = arith.constant 0 : index
    %c0_2 = arith.constant 0 : index
    %2 = vector.load %arg2[%c0_1, %c0_2] : memref<16x32xf32, #tpu.memory_space<vmem>>, vector<16x32xf32>
    %3 = arith.truncf %2 : vector<16x32xf32> to vector<16x32xbf16>
    %cst = arith.constant dense<0.000000e+00> : vector<8x32xf32>
    %4 = tpu.matmul %1, %3, %cst {dimension_numbers = #tpu.dot_dimension_numbers<[1], [0], [0], [1], [0, 0, 1, 1], [], []>} : vector<8x16xbf16>, vector<16x32xbf16>, vector<8x32xf32> -> vector<8x32xf32>
    %c0_3 = arith.constant 0 : index
    %c0_4 = arith.constant 0 : index
    %5 = vector.load %arg3[%c0_3, %c0_4] : memref<1x32xf32, #tpu.memory_space<vmem>>, vector<1x32xf32>
    %6 = vector.broadcast %5 : vector<1x32xf32> to vector<8x32xf32>
    %7 = arith.addf %4, %6 : vector<8x32xf32>
    %cst_5 = arith.constant 0.000000e+00 : f32
    %8 = vector.broadcast %cst_5 : f32 to vector<8x32xf32>
    %9 = arith.cmpf ogt, %7, %8 : vector<8x32xf32>
    %10 = math.exp %7 : vector<8x32xf32>
    %cst_6 = arith.constant 1.000000e+00 : f32
    %11 = vector.broadcast %cst_6 : f32 to vector<8x32xf32>
    %12 = arith.subf %10, %11 : vector<8x32xf32>
    %13 = arith.select %9, %7, %12 : vector<8x32xi1>, vector<8x32xf32>
    %14 = arith.truncf %13 : vector<8x32xf32> to vector<8x32xbf16>
    %c0_7 = arith.constant 0 : index
    %c0_8 = arith.constant 0 : index
    %15 = vector.load %arg4[%c0_7, %c0_8] : memref<32x16xf32, #tpu.memory_space<vmem>>, vector<32x16xf32>
    %16 = arith.truncf %15 : vector<32x16xf32> to vector<32x16xbf16>
    %cst_9 = arith.constant dense<0.000000e+00> : vector<8x16xf32>
    %17 = tpu.matmul %14, %16, %cst_9 {dimension_numbers = #tpu.dot_dimension_numbers<[1], [0], [0], [1], [0, 0, 1, 1], [], []>} : vector<8x32xbf16>, vector<32x16xbf16>, vector<8x16xf32> -> vector<8x16xf32>
    %c0_10 = arith.constant 0 : index
    %c0_11 = arith.constant 0 : index
    %18 = vector.load %arg5[%c0_10, %c0_11] : memref<1x16xf32, #tpu.memory_space<vmem>>, vector<1x16xf32>
    %19 = vector.broadcast %18 : vector<1x16xf32> to vector<8x16xf32>
    %20 = arith.addf %17, %19 : vector<8x16xf32>
    %cst_12 = arith.constant 0.000000e+00 : f32
    %21 = vector.broadcast %cst_12 : f32 to vector<8x16xf32>
    %22 = arith.cmpf ogt, %20, %21 : vector<8x16xf32>
    %23 = math.exp %20 : vector<8x16xf32>
    %cst_13 = arith.constant 1.000000e+00 : f32
    %24 = vector.broadcast %cst_13 : f32 to vector<8x16xf32>
    %25 = arith.subf %23, %24 : vector<8x16xf32>
    %26 = arith.select %22, %20, %25 : vector<8x16xi1>, vector<8x16xf32>
    %27 = arith.truncf %26 : vector<8x16xf32> to vector<8x16xbf16>
    %c0_14 = arith.constant 0 : index
    %c0_15 = arith.constant 0 : index
    %28 = vector.load %arg6[%c0_14, %c0_15] : memref<8x16xbf16, #tpu.memory_space<vmem>>, vector<8x16xbf16>
    tpu.vector_store %arg6[%c0_14, %c0_15], %27 {strides = array<i32>} : memref<8x16xbf16, #tpu.memory_space<vmem>>, vector<8x16xbf16>,
    %c8_i32 = arith.constant 8 : i32
    %29 = arith.muli %arg0, %c8_i32 : i32
    %30 = tpu.iota {dimensions = array<i32: 0>} : vector<8x1xi32>
    %31 = vector.broadcast %29 : i32 to vector<8x1xi32>
    %32 = arith.addi %31, %30 : vector<8x1xi32>
    %c16_i32 = arith.constant 16 : i32
    %33 = vector.broadcast %c16_i32 : i32 to vector<8x1xi32>
    %34 = arith.cmpi slt, %32, %33 : vector<8x1xi32>
    %cst_16 = arith.constant 0.000000e+00 : f32
    %35 = vector.shape_cast %34 : vector<8x1xi1> to vector<8x1xi1>
    %36 = vector.broadcast %35 : vector<8x1xi1> to vector<8x16xi1>
    %37 = vector.broadcast %cst_16 : f32 to vector<8x16xf32>
    %38 = arith.select %36, %26, %37 : vector<8x16xi1>, vector<8x16xf32>
    %cst_17 = arith.constant dense<0.000000e+00> : vector<16xf32>
    %39 = vector.multi_reduction <add>, %38, %cst_17 [0] : vector<8x16xf32> to vector<16xf32>
    %40 = vector.shape_cast %39 : vector<16xf32> to vector<1x16xf32>
    %41 = arith.mulf %38, %38 : vector<8x16xf32>
    %cst_18 = arith.constant dense<0.000000e+00> : vector<16xf32>
    %42 = vector.multi_reduction <add>, %41, %cst_18 [0] : vector<8x16xf32> to vector<16xf32>
    %43 = vector.shape_cast %42 : vector<16xf32> to vector<1x16xf32>
    %44 = tpu.concatenate %40, %43 in 0 : vector<1x16xf32>, vector<1x16xf32> -> vector<2x16xf32>
    %c0_19 = arith.constant 0 : index
    %c0_20 = arith.constant 0 : index
    %c0_21 = arith.constant 0 : index
    %45 = vector.load %arg7[%c0_19, %c0_20, %c0_21] : memref<1x2x16xf32, #tpu.memory_space<vmem>>, vector<1x2x16xf32>
    %46 = vector.shape_cast %45 : vector<1x2x16xf32> to vector<2x16xf32>
    %47 = vector.shape_cast %44 : vector<2x16xf32> to vector<1x2x16xf32>
    tpu.vector_store %arg7[%c0_19, %c0_20, %c0_21], %47 {strides = array<i32>} : memref<1x2x16xf32, #tpu.memory_space<vmem>>, vector<1x2x16xf32>,
    return
  }
  func.func @transform_0(%arg0: i32) -> (i32, i32) {
    %c0_i32 = arith.constant 0 : i32
    %c0_i32_0 = arith.constant 0 : i32
    return %arg0, %c0_i32 : i32, i32
  }
  func.func @transform_1(%arg0: i32) -> (i32, i32) {
    %c0_i32 = arith.constant 0 : i32
    %c0_i32_0 = arith.constant 0 : i32
    %c0_i32_1 = arith.constant 0 : i32
    return %c0_i32, %c0_i32_0 : i32, i32
  }
  func.func @transform_2(%arg0: i32) -> (i32, i32) {
    %c0_i32 = arith.constant 0 : i32
    %c0_i32_0 = arith.constant 0 : i32
    %c0_i32_1 = arith.constant 0 : i32
    return %c0_i32, %c0_i32_0 : i32, i32
  }
  func.func @transform_3(%arg0: i32) -> (i32, i32) {
    %c0_i32 = arith.constant 0 : i32
    %c0_i32_0 = arith.constant 0 : i32
    %c0_i32_1 = arith.constant 0 : i32
    return %c0_i32, %c0_i32_0 : i32, i32
  }
  func.func @transform_4(%arg0: i32) -> (i32, i32) {
    %c0_i32 = arith.constant 0 : i32
    %c0_i32_0 = arith.constant 0 : i32
    %c0_i32_1 = arith.constant 0 : i32
    return %c0_i32, %c0_i32_0 : i32, i32
  }
  func.func @transform_5(%arg0: i32) -> (i32, i32) {
    %c0_i32 = arith.constant 0 : i32
    %c0_i32_0 = arith.constant 0 : i32
    return %arg0, %c0_i32 : i32, i32
  }
  func.func @transform_6(%arg0: i32) -> (i32, i32, i32) {
    %c0_i32 = arith.constant 0 : i32
    %c0_i32_0 = arith.constant 0 : i32
    %c0_i32_1 = arith.constant 0 : i32
    return %arg0, %c0_i32, %c0_i32_0 : i32, i32, i32
  }
}

module attributes {stable_mosaic.version = 11 : i64} {
  func.func @kernel(%arg0: i32, %arg1: memref<8x16xf32, #tpu.memory_space<vmem>>, %arg2: memref<16x32xf32, #tpu.memory_space<vmem>>, %arg3: memref<1x32xf32, #tpu.memory_space<vmem>>, %arg4: memref<32x16xf32, #tpu.memory_space<vmem>>, %arg5: memref<1x16xf32, #tpu.memory_space<vmem>>, %arg6: memref<8x16xbf16, #tpu.memory_space<vmem>>, %arg7: memref<1x2x16xf32, #tpu.memory_space<vmem>>) attributes {dimension_semantics = [#tpu.dimension_semantics<parallel>], iteration_bounds = array<i64: 2>, scalar_prefetch = 0 : i64, scratch_operands = 0 : i64, tpu.core_type = #tpu.core_type<tc>, window_params = [{transform_indices = @transform_0, window_bounds = array<i64: 8, 16>}, {pipeline_mode = #tpu.pipeline_mode<synchronous>, transform_indices = @transform_1, window_bounds = array<i64: 16, 32>}, {pipeline_mode = #tpu.pipeline_mode<synchronous>, transform_indices = @transform_2, window_bounds = array<i64: 1, 32>}, {pipeline_mode = #tpu.pipeline_mode<synchronous>, transform_indices = @transform_3, window_bounds = array<i64: 32, 16>}, {pipeline_mode = #tpu.pipeline_mode<synchronous>, transform_indices = @transform_4, window_bounds = array<i64: 1, 16>}, {transform_indices = @transform_5, window_bounds = array<i64: 8, 16>}, {transform_indices = @transform_6, window_bounds = array<i64: 1, 2, 16>}]} {
    %c0 = arith.constant 0 : index
    %c0_0 = arith.constant 0 : index
    %0 = vector.load %arg1[%c0, %c0_0] : memref<8x16xf32, #tpu.memory_space<vmem>>, vector<8x16xf32>
    %1 = arith.truncf %0 : vector<8x16xf32> to vector<8x16xbf16>
    %c0_1 = arith.constant 0 : index
    %c0_2 = arith.constant 0 : index
    %2 = vector.load %arg2[%c0_1, %c0_2] : memref<16x32xf32, #tpu.memory_space<vmem>>, vector<16x32xf32>
    %3 = arith.truncf %2 : vector<16x32xf32> to vector<16x32xbf16>
    %cst = arith.constant dense<0.000000e+00> : vector<8x32xf32>
    %4 = tpu.matmul %1, %3, %cst {dimension_numbers = #tpu.dot_dimension_numbers<[1], [0], [0], [1], [0, 0, 1, 1], [], []>} : vector<8x16xbf16>, vector<16x32xbf16>, vector<8x32xf32> -> vector<8x32xf32>
    %c0_3 = arith.constant 0 : index
    %c0_4 = arith.constant 0 : index
    %5 = vector.load %arg3[%c0_3, %c0_4] : memref<1x32xf32, #tpu.memory_space<vmem>>, vector<1x32xf32>
    %6 = vector.broadcast %5 : vector<1x32xf32> to vector<8x32xf32>
    %7 = arith.addf %4, %6 : vector<8x32xf32>
    %cst_5 = arith.constant 0.000000e+00 : f32
    %8 = vector.broadcast %cst_5 : f32 to vector<8x32xf32>
    %9 = arith.cmpf ogt, %7, %8 : vector<8x32xf32>
    %10 = math.exp %7 : vector<8x32xf32>
    %cst_6 = arith.constant 1.000000e+00 : f32
    %11 = vector.broadcast %cst_6 : f32 to vector<8x32xf32>
    %12 = arith.subf %10, %11 : vector<8x32xf32>
    %13 = arith.select %9, %7, %12 : vector<8x32xi1>, vector<8x32xf32>
    %14 = arith.truncf %13 : vector<8x32xf32> to vector<8x32xbf16>
    %c0_7 = arith.constant 0 : index
    %c0_8 = arith.constant 0 : index
    %15 = vector.load %arg4[%c0_7, %c0_8] : memref<32x16xf32, #tpu.memory_space<vmem>>, vector<32x16xf32>
    %16 = arith.truncf %15 : vector<32x16xf32> to vector<32x16xbf16>
    %cst_9 = arith.constant dense<0.000000e+00> : vector<8x16xf32>
    %17 = tpu.matmul %14, %16, %cst_9 {dimension_numbers = #tpu.dot_dimension_numbers<[1], [0], [0], [1], [0, 0, 1, 1], [], []>} : vector<8x32xbf16>, vector<32x16xbf16>, vector<8x16xf32> -> vector<8x16xf32>
    %c0_10 = arith.constant 0 : index
    %c0_11 = arith.constant 0 : index
    %18 = vector.load %arg5[%c0_10, %c0_11] : memref<1x16xf32, #tpu.memory_space<vmem>>, vector<1x16xf32>
    %19 = vector.broadcast %18 : vector<1x16xf32> to vector<8x16xf32>
    %20 = arith.addf %17, %19 : vector<8x16xf32>
    %cst_12 = arith.constant 0.000000e+00 : f32
    %21 = vector.broadcast %cst_12 : f32 to vector<8x16xf32>
    %22 = arith.cmpf ogt, %20, %21 : vector<8x16xf32>
    %23 = math.exp %20 : vector<8x16xf32>
    %cst_13 = arith.constant 1.000000e+00 : f32
    %24 = vector.broadcast %cst_13 : f32 to vector<8x16xf32>
    %25 = arith.subf %23, %24 : vector<8x16xf32>
    %26 = arith.select %22, %20, %25 : vector<8x16xi1>, vector<8x16xf32>
    %27 = arith.truncf %26 : vector<8x16xf32> to vector<8x16xbf16>
    %c0_14 = arith.constant 0 : index
    %c0_15 = arith.constant 0 : index
    %28 = vector.load %arg6[%c0_14, %c0_15] : memref<8x16xbf16, #tpu.memory_space<vmem>>, vector<8x16xbf16>
    tpu.vector_store %arg6[%c0_14, %c0_15], %27 {strides = array<i32>} : memref<8x16xbf16, #tpu.memory_space<vmem>>, vector<8x16xbf16>,
    %c8_i32 = arith.constant 8 : i32
    %29 = arith.muli %arg0, %c8_i32 : i32
    %30 = tpu.iota {dimensions = array<i32: 0>} : vector<8x1xi32>
    %31 = vector.broadcast %29 : i32 to vector<8x1xi32>
    %32 = arith.addi %31, %30 : vector<8x1xi32>
    %c16_i32 = arith.constant 16 : i32
    %33 = vector.broadcast %c16_i32 : i32 to vector<8x1xi32>
    %34 = arith.cmpi slt, %32, %33 : vector<8x1xi32>
    %cst_16 = arith.constant 0.000000e+00 : f32
    %35 = vector.shape_cast %34 : vector<8x1xi1> to vector<8x1xi1>
    %36 = vector.broadcast %35 : vector<8x1xi1> to vector<8x16xi1>
    %37 = vector.broadcast %cst_16 : f32 to vector<8x16xf32>
    %38 = arith.select %36, %26, %37 : vector<8x16xi1>, vector<8x16xf32>
    %cst_17 = arith.constant dense<0.000000e+00> : vector<16xf32>
    %39 = vector.multi_reduction <add>, %38, %cst_17 [0] : vector<8x16xf32> to vector<16xf32>
    %40 = vector.shape_cast %39 : vector<16xf32> to vector<1x16xf32>
    %41 = arith.mulf %38, %38 : vector<8x16xf32>
    %cst_18 = arith.constant dense<0.000000e+00> : vector<16xf32>
    %42 = vector.multi_reduction <add>, %41, %cst_18 [0] : vector<8x16xf32> to vector<16xf32>
    %43 = vector.shape_cast %42 : vector<16xf32> to vector<1x16xf32>
    %44 = tpu.concatenate %40, %43 in 0 : vector<1x16xf32>, vector<1x16xf32> -> vector<2x16xf32>
    %c0_19 = arith.constant 0 : index
    %c0_20 = arith.constant 0 : index
    %c0_21 = arith.constant 0 : index
    %45 = vector.load %arg7[%c0_19, %c0_20, %c0_21] : memref<1x2x16xf32, #tpu.memory_space<vmem>>, vector<1x2x16xf32>
    %46 = vector.shape_cast %45 : vector<1x2x16xf32> to vector<2x16xf32>
    %47 = vector.shape_cast %44 : vector<2x16xf32> to vector<1x2x16xf32>
    tpu.vector_store %arg7[%c0_19, %c0_20, %c0_21], %47 {strides = array<i32>} : memref<1x2x16xf32, #tpu.memory_space<vmem>>, vector<1x2x16xf32>,
    return
  }
  func.func @transform_0(%arg0: i32) -> (i32, i32) {
    %c0_i32 = arith.constant 0 : i32
    %c0_i32_0 = arith.constant 0 : i32
    return %arg0, %c0_i32 : i32, i32
  }
  func.func @transform_1(%arg0: i32) -> (i32, i32) {
    %c0_i32 = arith.constant 0 : i32
    %c0_i32_0 = arith.constant 0 : i32
    %c0_i32_1 = arith.constant 0 : i32
    return %c0_i32, %c0_i32_0 : i32, i32
  }
  func.func @transform_2(%arg0: i32) -> (i32, i32) {
    %c0_i32 = arith.constant 0 : i32
    %c0_i32_0 = arith.constant 0 : i32
    %c0_i32_1 = arith.constant 0 : i32
    return %c0_i32, %c0_i32_0 : i32, i32
  }
  func.func @transform_3(%arg0: i32) -> (i32, i32) {
    %c0_i32 = arith.constant 0 : i32
    %c0_i32_0 = arith.constant 0 : i32
    %c0_i32_1 = arith.constant 0 : i32
    return %c0_i32, %c0_i32_0 : i32, i32
  }
  func.func @transform_4(%arg0: i32) -> (i32, i32) {
    %c0_i32 = arith.constant 0 : i32
    %c0_i32_0 = arith.constant 0 : i32
    %c0_i32_1 = arith.constant 0 : i32
    return %c0_i32, %c0_i32_0 : i32, i32
  }
  func.func @transform_5(%arg0: i32) -> (i32, i32) {
    %c0_i32 = arith.constant 0 : i32
    %c0_i32_0 = arith.constant 0 : i32
    return %arg0, %c0_i32 : i32, i32
  }
  func.func @transform_6(%arg0: i32) -> (i32, i32, i32) {
    %c0_i32 = arith.constant 0 : i32
    %c0_i32_0 = arith.constant 0 : i32
    %c0_i32_1 = arith.constant 0 : i32
    return %arg0, %c0_i32, %c0_i32_0 : i32, i32, i32
  }
}

</mosaic_0001>

<bundles_post_ra>
// kernel: tpu_custom_call.1
= control target key start
LH: loop header
LB: loop body
LE: loop exit
PB: predicated region body
PF: predicated region fallthrough
CT: control target
= control target key end

     0   :  { %12 = vsyncpa [#allocation3], 0  ;;  %s813_s0 = inlined_call_operand.vmem [shape: f32[16,16], index: 0, kind: input, shape index: {}]   ;;  %s814_s1 = inlined_call_operand.vmem [shape: f32[16,32], index: 1, kind: input, shape index: {}]   ;;  %s815_s2 = inlined_call_operand.vmem [shape: f32[1,32], index: 2, kind: input, shape index: {}]   ;;  %s816_s3 = inlined_call_operand.vmem [shape: f32[32,16], index: 3, kind: input, shape index: {}]   ;;  %s817_s4 = inlined_call_operand.vmem [shape: f32[1,16], index: 4, kind: input, shape index: {}]   ;;  %s818_s5 = inlined_call_operand.hbm [shape: bf16[16,16], index: 5, kind: output, shape index: {0}]   ;;  %s819_s6 = inlined_call_operand.hbm [shape: f32[2,2,16], index: 6, kind: output, shape index: {1}]  }
   0x1   :  { %14 = vsyncpa [#allocation3 + $0x1], 0 }
   0x2   :  { %15 = vsyncpa [#allocation5], 0 }
   0x3   :  { %17 = vsyncpa [#allocation5 + $0x1], 0  ;;  %s680_s21 = smov 0   ;;  %s682_s22 = smov 0  }
   0x4   :  { %s684_s23 = smov 0   ;;  %s686_s24 = smov 0  }
   0x5 LB: > { %s701_s25 = sadd.s32 4294967295, %s643_s24   ;;  %s481_s26 = sadd.s32 4294967294, %s643_s24   ;;  %s643_s24 = sphi %s686_s24, %s825_s24   ;;  %s639_s23 = sphi %s684_s23, %s824_s23   ;;  %s635_s22 = sphi %s682_s22, %s823_s22   ;;  %s631_s21 = sphi %s680_s21, %s822_s21  }
   0x6   : > { %s705_s27 = sadd.s32 1, %s643_s24   ;;  %s140_s28 = sadd.s32 1, %s639_s23 }
   0x7   : > { %s137_s29 = ssub.s32 %s643_s24, %s705_s27  ;;  %p150_p0 = scmp.ne.s32.totalorder %s639_s23, %s635_s22 }
   0x8   : > { %p138_p1 = scmp.eq.s32.totalorder %s137_s29, 0  ;;  %p151_p2 = scmp.eq.s32.totalorder %s701_s25, 1 }
   0x9   : > { %p156_p3 = scmp.ne.s32.totalorder %s635_s22, %s631_s21  ;;  %p157_p4 = scmp.eq.s32.totalorder %s481_s26, 1 }
   0xa   : > { %s716_s30 = scalar_select %p138_p1, %s639_s23, %s140_s28  }
   0xb   : > { %p718_p5 = por %p151_p2, %p150_p0  ;;  %p722_p6 = por %p157_p4, %p156_p3 }
   0xc   : > { %p484_p7 = scmp.ge.s32.totalorder %s643_s24, 1  ;;  %p220_p8 = scmp.lt.s32.totalorder %s643_s24, 3 }
   0xe   : > { %p221_p9 = pnand %p484_p7, %p220_p8 }
   0xf   : > { %p254_p10 = scmp.lt.s32.totalorder (!%p221_p9), %s701_s25, 1  ;;  %s492_s15 = sshll.u32 (!%p221_p9), %s701_s25, 3 }
  0x10   : > { %224 = sbr.rel (%p221_p9) target bundleno = 331 (0x14b), region = 40  ;;  %s760_s16 = sand.u32 (!%p221_p9), 1, %s635_s22  }
  0x11   : > { %s485_s18 = sshll.u32 (!%p221_p9), %s760_s16, 2  ;;  %s355_s10 = scalar_lea.sflag (!%p221_p9), [#allocation3], %s760_s16 }
  0x12   : > { %s246_s28 = scalar_lea.vmem (!%p221_p9), [#allocation2], %s485_s18 }
  0x13   : > { %s372_s29 = sshll.u32 (!%p221_p9), %s246_s28, 4  ;;  %s373_s29 = int_to_ptr.vmem [resolvable:$true] %s372_s29 }
  0x15   : > { %v261_v0 = vld [vmem:[%s814_s1] sm:$0xff]  ;;  %v262_v1 = vld [vmem:[%s814_s1 + $0x8] sm:$0xff]  ;;  %s255_s13 = scalar_select %p254_p10, %s701_s25, 1  ;;  %vm268_vm0 = vcmask 130048   ;;  %v293_v5 = vld [vmem:[%s816_s3 + $0x10] sm:$0xff]  ;;  %vm301_vm2 = vcmask 261120   ;;  %v327_v22 = vlaneseq  ;;  %v329_v26 = vstv %s492_s15 }
  0x16   : > { %v263_v2 = vpack.c.bf16 %v262_v1, %v261_v0  ;;  %v294_v6 = vld [vmem:[%s816_s3 + $0x18] sm:$0xff]  ;;  %v291_v8 = vld [vmem:[%s816_s3] sm:$0xff]  ;;  %v292_v9 = vld [vmem:[%s816_s3 + $0x8] sm:$0xff]  ;;  %vm324_vm5 = vcmask 125952   ;;  %s569_s15 = scalar_lea.hbm %s818_s5, 8 }
  0x17   : > { %s487_s14 = sshll.u32 %s255_s13, 3  ;;  %v296_v7 = vpack.c.bf16 %v294_v6, %v293_v5  ;;  %v295_v10 = vpack.c.bf16 %v292_v9, %v291_v8  ;;  %v543_v11 = vld [vmem:[%s815_s2] ss:$0 sm:$0xff]  ;;  %v328_v25 = vshrl.u32 %v327_v22, 7 }
  0x18   : > { %279 = vmatpush.bf16.msra.mxu0 %v263_v2  ;;  %s257_s17 = scalar_lea.vmem %s813_s0, %s487_s14  ;;  %v544_v20 = vld [vmem:[%s817_s4] ss:$0 sm:$0xff] }
  0x19   : > { %v259_v3 = vld [vmem:[%s257_s17] sm:$0xff]  ;;  %311 = vmatpush.bf16.msra.mxu1 %v296_v7  ;;  %s495_s17 = sshll.u32 %s701_s25, 2  ;;  %v330_v27 = vadd.s32 %v329_v26, %v328_v25 }
  0x1a   : > { %v260_v4 = vpack.c.bf16 %v259_v3, %v259_v3  ;;  %s370_s26 = scalar_lea.hbm %s818_s5, %s495_s17 }
  0x1b   : > { %vm331_vm3 = vcmp.lt.s32.totalorder %v330_v27, 16  ;;  %s374_s9 = sshll.u32 %s370_s26, 4  ;;  %s375_s9 = int_to_ptr.hbm [resolvable:$true] %s374_s9 }
  0x1c   : > { %488 = vmatmul.msk.bf16.vlgmr.msra.gmra.mxu0 %vm268_vm0, %v260_v4  ;;  %s563_s11 = sshra.s32 %s375_s9, 4  ;;  %s564_s11 = int_to_ptr.hbm [resolvable:$true] %s563_s11 }
  0x1d   : > { %312 = vmatpush.bf16.msra.mxu1 %v295_v10  ;;  %s565_s12 = scalar_lea.hbm %s564_s11, 4  ;;  %p570_p0 = scmp.lt.s32.totalorder %s564_s11, %s818_s5 }
  0x1e   : > { %p566_p11 = scmp.ne.s32.totalorder %s564_s11, %s565_s12  ;;  %p571_p1 = scmp.lt.s32.totalorder %s569_s15, %s565_s12 }
  0x20   : > { %p567_p12 = pnand %p566_p11, %p718_p5  ;;  %p572_p2 = por %p571_p1, %p570_p0 }
  0x22   : > { %p568_p13 = pneg %p567_p12 }
  0x24   : > { %p573_p3 = pnand %p572_p2, %p568_p13 }
  0x99   : > { %v281_v12 = vpop.f32.mrf.mxu0 }
  0x9a   : > { %v282_v13 = vadd.f32 %v543_v11, %v281_v12 }
  0x9c   : > { %v286_v14 = vmul.f32 1.442695, %v282_v13  ;;  %vm285_vm1 = vcmp.gt.f32.partialorder %v282_v13, 0.0 }
  0x9e   : > { %545 = vpow2.f32 %v286_v14 }
  0xa1   : > { %v283_v15 = vpop.f32.mrf.mxu0 }
  0xa4   : > { %v546_v16 = vpop.eup %545 }
  0xa5   : > { %v489_v17 = vadd.f32 -1.0, %v546_v16 }
  0xa7   : > { %v289_v18 = vsel %vm285_vm1, %v282_v13, %v489_v17 }
  0xa8   : > { %v290_v19 = vpack.c.bf16 %v289_v18, %v289_v18 }
  0xaa   : > { %490 = vmatmul.msk.bf16.vlgmr.msra.gmra.mxu1 %vm301_vm2, %v290_v19 }
 0x127   : > { %v314_v21 = vpop.f32.mrf.mxu1 }
 0x128   : > { %v315_v23 = vadd.f32 %v544_v20, %v314_v21 }
 0x12a   : > { %v319_v24 = vmul.f32 1.442695, %v315_v23  ;;  %vm318_vm4 = vcmp.gt.f32.partialorder %v315_v23, 0.0 }
 0x12c   : > { %547 = vpow2.f32 %v319_v24 }
 0x12f   : > { %v316_v28 = vpop.f32.mrf.mxu1 }
 0x132   : > { %v548_v29 = vpop.eup %547 }
 0x133   : > { %v491_v30 = vadd.f32 -1.0, %v548_v29 }
 0x135   : > { %v322_v31 = vsel %vm318_vm4, %v315_v23, %v491_v30 }
 0x136   : > { %v323_v32 = vpack.c.bf16 %v322_v31, %v322_v31  ;;  %v334_v33 = vsel %vm331_vm3, %v322_v31, 0.0 }
 0x137   : > { %v335_v34 = vsel %vm268_vm0, %v334_v33, 0.0  ;;  %v342_v35 = vmul.f32 %v334_v33, %v334_v33 }
 0x138   : > { %v336_v36 = vrot.slane %v335_v34, 4  ;;  %325 = vst.msk [vmem:[%s246_s28] sm:$0xf] %vm324_vm5, %v323_v32 }
 0x139   : > { %v343_v37 = vsel %vm268_vm0, %v342_v35, 0.0 }
 0x13a   : > { %576 = shalt.err (!%p573_p3)
}
 0x13b   : > { %499 = dma.vmem_to_hbm [thread:$0]  (%p718_p5), %s373_s29, 64, %s375_s9, %s355_s10   ;;  %v337_v38 = vadd.f32 %v336_v36, %v335_v34  ;;  %v344_v39 = vrot.slane %v343_v37, 4  ;;  %vm350_vm6 = vcmask 1040384   ;;  %vm352_vm7 = vcmask 123904  }
 0x13c   : > { %s486_s19 = sshll.u32 %s760_s16, 1  ;;  %s496_s20 = sshll.u32 %s701_s25, 1 }
 0x13d   : > { %v338_v40 = vrot.slane %v337_v38, 2  ;;  %v345_v41 = vadd.f32 %v344_v39, %v343_v37  ;;  %s384_s11 = scalar_lea.hbm %s819_s6, %s496_s20  ;;  %s253_s12 = scalar_lea.vmem [#allocation4], %s486_s19 }
 0x13e   : > { %s386_s13 = sshll.u32 %s253_s12, 4  ;;  %s388_s29 = sshll.u32 %s384_s11, 4  ;;  %s387_s13 = int_to_ptr.vmem [resolvable:$true] %s386_s13  ;;  %s389_s29 = int_to_ptr.hbm [resolvable:$true] %s388_s29 }
 0x13f   : > { %v339_v42 = vadd.f32 %v338_v40, %v337_v38  ;;  %v346_v43 = vrot.slane %v345_v41, 2  ;;  %s360_s25 = scalar_lea.sflag [#allocation5], %s760_s16  ;;  %s591_s9 = sshra.s32 %s389_s29, 4  ;;  %s592_s9 = int_to_ptr.hbm [resolvable:$true] %s591_s9 }
 0x140   : > { %s593_s10 = scalar_lea.hbm %s592_s9, 2  ;;  %s597_s17 = scalar_lea.hbm %s819_s6, 4 }
 0x141   : > { %v340_v44 = vrot.slane %v339_v42, 1  ;;  %v347_v45 = vadd.f32 %v346_v43, %v345_v41  ;;  %p594_p4 = scmp.ne.s32.totalorder %s592_s9, %s593_s10  ;;  %p598_p9 = scmp.lt.s32.totalorder %s592_s9, %s819_s6 }
 0x142   : > { %p599_p10 = scmp.lt.s32.totalorder %s597_s17, %s593_s10 }
 0x143   : > { %v348_v46 = vrot.slane %v347_v45, 1  ;;  %v341_v47 = vadd.f32 %v340_v44, %v339_v42  ;;  %p595_p7 = pnand %p594_p4, %p718_p5 }
 0x144   : > { %p600_p11 = por %p599_p10, %p598_p9 }
 0x145   : > { %v349_v48 = vadd.f32 %v348_v46, %v347_v45  ;;  %p596_p8 = pneg %p595_p7 }
 0x147   : > { %v351_v49 = vsel %vm350_vm6, %v341_v47, %v349_v48  ;;  %p601_p12 = pnand %p600_p11, %p596_p8 }
 0x148   : > { %353 = vst.msk [vmem:[%s253_s12] sm:$0x3] %vm352_vm7, %v351_v49 }
 0x149   : > { %604 = shalt.err (!%p601_p12)
}
 0x14a   : > { %500 = dma.vmem_to_hbm [thread:$0]  (%p718_p5), %s387_s13, 32, %s389_s29, %s360_s25  }
 0x14b PF: > { %p510_p13 = scmp.ge.s32.totalorder %s643_s24, 2  ;;  %s400_s16 = sand.u32 1, %s631_s21  }
 0x14c   : > { %s401_s20 = scalar_lea.sflag [#allocation3], %s400_s16 }
 0x14d   : > { %p504_p0 = pnand %p510_p13, %p722_p6 }
 0x14f   : > { %p505_p1 = pneg %p504_p0 }
 0x151   : > { %622 = dma.done.wait (%p505_p1), %s401_s20, 64  }
 0x152   : > { %624 = vsyncadd (%p505_p1), %s401_s20, 4294967232  ;;  %s411_s26 = scalar_lea.sflag [#allocation5], %s400_s16 }
 0x153   : > { %626 = dma.done.wait (%p505_p1), %s411_s26, 32  }
 0x154   : > { %628 = vsyncadd (%p505_p1), %s411_s26, 4294967264  ;;  %p20_p5 = scmp.ge.s32.totalorder %s705_s27, 4   ;;  %s822_s21 = smov %s635_s22 }
 0x155   : > { %s823_s22 = smov %s639_s23  ;;  %s824_s23 = smov %s716_s30 }
 0x156   : > { %s825_s24 = smov %s705_s27  ;;  %22 = sbr.rel (!%p20_p5) target bundleno = 5 (0x5), region = 92 }
 0x15b   :  { %417 = vsyncpa [#allocation3], 1 }
 0x15c   :  { %419 = vsyncpa [#allocation3 + $0x1], 1 }
 0x15d   :  { %420 = vsyncpa [#allocation5], 1 }
 0x15e   :  { %422 = vsyncpa [#allocation5 + $0x1], 1 }

// kernel: tpu_custom_call.1
= control target key start
LH: loop header
LB: loop body
LE: loop exit
PB: predicated region body
PF: predicated region fallthrough
CT: control target
= control target key end

     0   :  { %12 = vsyncpa [#allocation3], 0  ;;  %s813_s0 = inlined_call_operand.vmem [shape: f32[16,16], index: 0, kind: input, shape index: {}]   ;;  %s814_s1 = inlined_call_operand.vmem [shape: f32[16,32], index: 1, kind: input, shape index: {}]   ;;  %s815_s2 = inlined_call_operand.vmem [shape: f32[1,32], index: 2, kind: input, shape index: {}]   ;;  %s816_s3 = inlined_call_operand.vmem [shape: f32[32,16], index: 3, kind: input, shape index: {}]   ;;  %s817_s4 = inlined_call_operand.vmem [shape: f32[1,16], index: 4, kind: input, shape index: {}]   ;;  %s818_s5 = inlined_call_operand.hbm [shape: bf16[16,16], index: 5, kind: output, shape index: {0}]   ;;  %s819_s6 = inlined_call_operand.hbm [shape: f32[2,2,16], index: 6, kind: output, shape index: {1}]  }
   0x1   :  { %14 = vsyncpa [#allocation3 + $0x1], 0 }
   0x2   :  { %15 = vsyncpa [#allocation5], 0 }
   0x3   :  { %17 = vsyncpa [#allocation5 + $0x1], 0  ;;  %s680_s21 = smov 0   ;;  %s682_s22 = smov 0  }
   0x4   :  { %s684_s23 = smov 0   ;;  %s686_s24 = smov 0  }
   0x5 LB: > { %s701_s25 = sadd.s32 4294967295, %s643_s24   ;;  %s481_s26 = sadd.s32 4294967294, %s643_s24   ;;  %s643_s24 = sphi %s686_s24, %s825_s24   ;;  %s639_s23 = sphi %s684_s23, %s824_s23   ;;  %s635_s22 = sphi %s682_s22, %s823_s22   ;;  %s631_s21 = sphi %s680_s21, %s822_s21  }
   0x6   : > { %s705_s27 = sadd.s32 1, %s643_s24   ;;  %s140_s28 = sadd.s32 1, %s639_s23 }
   0x7   : > { %s137_s29 = ssub.s32 %s643_s24, %s705_s27  ;;  %p150_p0 = scmp.ne.s32.totalorder %s639_s23, %s635_s22 }
   0x8   : > { %p138_p1 = scmp.eq.s32.totalorder %s137_s29, 0  ;;  %p151_p2 = scmp.eq.s32.totalorder %s701_s25, 1 }
   0x9   : > { %p156_p3 = scmp.ne.s32.totalorder %s635_s22, %s631_s21  ;;  %p157_p4 = scmp.eq.s32.totalorder %s481_s26, 1 }
   0xa   : > { %s716_s30 = scalar_select %p138_p1, %s639_s23, %s140_s28  }
   0xb   : > { %p718_p5 = por %p151_p2, %p150_p0  ;;  %p722_p6 = por %p157_p4, %p156_p3 }
   0xc   : > { %p484_p7 = scmp.ge.s32.totalorder %s643_s24, 1  ;;  %p220_p8 = scmp.lt.s32.totalorder %s643_s24, 3 }
   0xe   : > { %p221_p9 = pnand %p484_p7, %p220_p8 }
   0xf   : > { %p254_p10 = scmp.lt.s32.totalorder (!%p221_p9), %s701_s25, 1  ;;  %s492_s15 = sshll.u32 (!%p221_p9), %s701_s25, 3 }
  0x10   : > { %224 = sbr.rel (%p221_p9) target bundleno = 331 (0x14b), region = 40  ;;  %s760_s16 = sand.u32 (!%p221_p9), 1, %s635_s22  }
  0x11   : > { %s485_s18 = sshll.u32 (!%p221_p9), %s760_s16, 2  ;;  %s355_s10 = scalar_lea.sflag (!%p221_p9), [#allocation3], %s760_s16 }
  0x12   : > { %s246_s28 = scalar_lea.vmem (!%p221_p9), [#allocation2], %s485_s18 }
  0x13   : > { %s372_s29 = sshll.u32 (!%p221_p9), %s246_s28, 4  ;;  %s373_s29 = int_to_ptr.vmem [resolvable:$true] %s372_s29 }
  0x15   : > { %v261_v0 = vld [vmem:[%s814_s1] sm:$0xff]  ;;  %v262_v1 = vld [vmem:[%s814_s1 + $0x8] sm:$0xff]  ;;  %s255_s13 = scalar_select %p254_p10, %s701_s25, 1  ;;  %vm268_vm0 = vcmask 130048   ;;  %v293_v5 = vld [vmem:[%s816_s3 + $0x10] sm:$0xff]  ;;  %vm301_vm2 = vcmask 261120   ;;  %v327_v22 = vlaneseq  ;;  %v329_v26 = vstv %s492_s15 }
  0x16   : > { %v263_v2 = vpack.c.bf16 %v262_v1, %v261_v0  ;;  %v294_v6 = vld [vmem:[%s816_s3 + $0x18] sm:$0xff]  ;;  %v291_v8 = vld [vmem:[%s816_s3] sm:$0xff]  ;;  %v292_v9 = vld [vmem:[%s816_s3 + $0x8] sm:$0xff]  ;;  %vm324_vm5 = vcmask 125952   ;;  %s569_s15 = scalar_lea.hbm %s818_s5, 8 }
  0x17   : > { %s487_s14 = sshll.u32 %s255_s13, 3  ;;  %v296_v7 = vpack.c.bf16 %v294_v6, %v293_v5  ;;  %v295_v10 = vpack.c.bf16 %v292_v9, %v291_v8  ;;  %v543_v11 = vld [vmem:[%s815_s2] ss:$0 sm:$0xff]  ;;  %v328_v25 = vshrl.u32 %v327_v22, 7 }
  0x18   : > { %279 = vmatpush.bf16.msra.mxu0 %v263_v2  ;;  %s257_s17 = scalar_lea.vmem %s813_s0, %s487_s14  ;;  %v544_v20 = vld [vmem:[%s817_s4] ss:$0 sm:$0xff] }
  0x19   : > { %v259_v3 = vld [vmem:[%s257_s17] sm:$0xff]  ;;  %311 = vmatpush.bf16.msra.mxu1 %v296_v7  ;;  %s495_s17 = sshll.u32 %s701_s25, 2  ;;  %v330_v27 = vadd.s32 %v329_v26, %v328_v25 }
  0x1a   : > { %v260_v4 = vpack.c.bf16 %v259_v3, %v259_v3  ;;  %s370_s26 = scalar_lea.hbm %s818_s5, %s495_s17 }
  0x1b   : > { %vm331_vm3 = vcmp.lt.s32.totalorder %v330_v27, 16  ;;  %s374_s9 = sshll.u32 %s370_s26, 4  ;;  %s375_s9 = int_to_ptr.hbm [resolvable:$true] %s374_s9 }
  0x1c   : > { %488 = vmatmul.msk.bf16.vlgmr.msra.gmra.mxu0 %vm268_vm0, %v260_v4  ;;  %s563_s11 = sshra.s32 %s375_s9, 4  ;;  %s564_s11 = int_to_ptr.hbm [resolvable:$true] %s563_s11 }
  0x1d   : > { %312 = vmatpush.bf16.msra.mxu1 %v295_v10  ;;  %s565_s12 = scalar_lea.hbm %s564_s11, 4  ;;  %p570_p0 = scmp.lt.s32.totalorder %s564_s11, %s818_s5 }
  0x1e   : > { %p566_p11 = scmp.ne.s32.totalorder %s564_s11, %s565_s12  ;;  %p571_p1 = scmp.lt.s32.totalorder %s569_s15, %s565_s12 }
  0x20   : > { %p567_p12 = pnand %p566_p11, %p718_p5  ;;  %p572_p2 = por %p571_p1, %p570_p0 }
  0x22   : > { %p568_p13 = pneg %p567_p12 }
  0x24   : > { %p573_p3 = pnand %p572_p2, %p568_p13 }
  0x99   : > { %v281_v12 = vpop.f32.mrf.mxu0 }
  0x9a   : > { %v282_v13 = vadd.f32 %v543_v11, %v281_v12 }
  0x9c   : > { %v286_v14 = vmul.f32 1.442695, %v282_v13  ;;  %vm285_vm1 = vcmp.gt.f32.partialorder %v282_v13, 0.0 }
  0x9e   : > { %545 = vpow2.f32 %v286_v14 }
  0xa1   : > { %v283_v15 = vpop.f32.mrf.mxu0 }
  0xa4   : > { %v546_v16 = vpop.eup %545 }
  0xa5   : > { %v489_v17 = vadd.f32 -1.0, %v546_v16 }
  0xa7   : > { %v289_v18 = vsel %vm285_vm1, %v282_v13, %v489_v17 }
  0xa8   : > { %v290_v19 = vpack.c.bf16 %v289_v18, %v289_v18 }
  0xaa   : > { %490 = vmatmul.msk.bf16.vlgmr.msra.gmra.mxu1 %vm301_vm2, %v290_v19 }
 0x127   : > { %v314_v21 = vpop.f32.mrf.mxu1 }
 0x128   : > { %v315_v23 = vadd.f32 %v544_v20, %v314_v21 }
 0x12a   : > { %v319_v24 = vmul.f32 1.442695, %v315_v23  ;;  %vm318_vm4 = vcmp.gt.f32.partialorder %v315_v23, 0.0 }
 0x12c   : > { %547 = vpow2.f32 %v319_v24 }
 0x12f   : > { %v316_v28 = vpop.f32.mrf.mxu1 }
 0x132   : > { %v548_v29 = vpop.eup %547 }
 0x133   : > { %v491_v30 = vadd.f32 -1.0, %v548_v29 }
 0x135   : > { %v322_v31 = vsel %vm318_vm4, %v315_v23, %v491_v30 }
 0x136   : > { %v323_v32 = vpack.c.bf16 %v322_v31, %v322_v31  ;;  %v334_v33 = vsel %vm331_vm3, %v322_v31, 0.0 }
 0x137   : > { %v335_v34 = vsel %vm268_vm0, %v334_v33, 0.0  ;;  %v342_v35 = vmul.f32 %v334_v33, %v334_v33 }
 0x138   : > { %v336_v36 = vrot.slane %v335_v34, 4  ;;  %325 = vst.msk [vmem:[%s246_s28] sm:$0xf] %vm324_vm5, %v323_v32 }
 0x139   : > { %v343_v37 = vsel %vm268_vm0, %v342_v35, 0.0 }
 0x13a   : > { %576 = shalt.err (!%p573_p3)
}
 0x13b   : > { %499 = dma.vmem_to_hbm [thread:$0]  (%p718_p5), %s373_s29, 64, %s375_s9, %s355_s10   ;;  %v337_v38 = vadd.f32 %v336_v36, %v335_v34  ;;  %v344_v39 = vrot.slane %v343_v37, 4  ;;  %vm350_vm6 = vcmask 1040384   ;;  %vm352_vm7 = vcmask 123904  }
 0x13c   : > { %s486_s19 = sshll.u32 %s760_s16, 1  ;;  %s496_s20 = sshll.u32 %s701_s25, 1 }
 0x13d   : > { %v338_v40 = vrot.slane %v337_v38, 2  ;;  %v345_v41 = vadd.f32 %v344_v39, %v343_v37  ;;  %s384_s11 = scalar_lea.hbm %s819_s6, %s496_s20  ;;  %s253_s12 = scalar_lea.vmem [#allocation4], %s486_s19 }
 0x13e   : > { %s386_s13 = sshll.u32 %s253_s12, 4  ;;  %s388_s29 = sshll.u32 %s384_s11, 4  ;;  %s387_s13 = int_to_ptr.vmem [resolvable:$true] %s386_s13  ;;  %s389_s29 = int_to_ptr.hbm [resolvable:$true] %s388_s29 }
 0x13f   : > { %v339_v42 = vadd.f32 %v338_v40, %v337_v38  ;;  %v346_v43 = vrot.slane %v345_v41, 2  ;;  %s360_s25 = scalar_lea.sflag [#allocation5], %s760_s16  ;;  %s591_s9 = sshra.s32 %s389_s29, 4  ;;  %s592_s9 = int_to_ptr.hbm [resolvable:$true] %s591_s9 }
 0x140   : > { %s593_s10 = scalar_lea.hbm %s592_s9, 2  ;;  %s597_s17 = scalar_lea.hbm %s819_s6, 4 }
 0x141   : > { %v340_v44 = vrot.slane %v339_v42, 1  ;;  %v347_v45 = vadd.f32 %v346_v43, %v345_v41  ;;  %p594_p4 = scmp.ne.s32.totalorder %s592_s9, %s593_s10  ;;  %p598_p9 = scmp.lt.s32.totalorder %s592_s9, %s819_s6 }
 0x142   : > { %p599_p10 = scmp.lt.s32.totalorder %s597_s17, %s593_s10 }
 0x143   : > { %v348_v46 = vrot.slane %v347_v45, 1  ;;  %v341_v47 = vadd.f32 %v340_v44, %v339_v42  ;;  %p595_p7 = pnand %p594_p4, %p718_p5 }
 0x144   : > { %p600_p11 = por %p599_p10, %p598_p9 }
 0x145   : > { %v349_v48 = vadd.f32 %v348_v46, %v347_v45  ;;  %p596_p8 = pneg %p595_p7 }
 0x147   : > { %v351_v49 = vsel %vm350_vm6, %v341_v47, %v349_v48  ;;  %p601_p12 = pnand %p600_p11, %p596_p8 }
 0x148   : > { %353 = vst.msk [vmem:[%s253_s12] sm:$0x3] %vm352_vm7, %v351_v49 }
 0x149   : > { %604 = shalt.err (!%p601_p12)
}
 0x14a   : > { %500 = dma.vmem_to_hbm [thread:$0]  (%p718_p5), %s387_s13, 32, %s389_s29, %s360_s25  }
 0x14b PF: > { %p510_p13 = scmp.ge.s32.totalorder %s643_s24, 2  ;;  %s400_s16 = sand.u32 1, %s631_s21  }
 0x14c   : > { %s401_s20 = scalar_lea.sflag [#allocation3], %s400_s16 }
 0x14d   : > { %p504_p0 = pnand %p510_p13, %p722_p6 }
 0x14f   : > { %p505_p1 = pneg %p504_p0 }
 0x151   : > { %622 = dma.done.wait (%p505_p1), %s401_s20, 64  }
 0x152   : > { %624 = vsyncadd (%p505_p1), %s401_s20, 4294967232  ;;  %s411_s26 = scalar_lea.sflag [#allocation5], %s400_s16 }
 0x153   : > { %626 = dma.done.wait (%p505_p1), %s411_s26, 32  }
 0x154   : > { %628 = vsyncadd (%p505_p1), %s411_s26, 4294967264  ;;  %p20_p5 = scmp.ge.s32.totalorder %s705_s27, 4   ;;  %s822_s21 = smov %s635_s22 }
 0x155   : > { %s823_s22 = smov %s639_s23  ;;  %s824_s23 = smov %s716_s30 }
 0x156   : > { %s825_s24 = smov %s705_s27  ;;  %22 = sbr.rel (!%p20_p5) target bundleno = 5 (0x5), region = 92 }
 0x15b   :  { %417 = vsyncpa [#allocation3], 1 }
 0x15c   :  { %419 = vsyncpa [#allocation3 + $0x1], 1 }
 0x15d   :  { %420 = vsyncpa [#allocation5], 1 }
 0x15e   :  { %422 = vsyncpa [#allocation5 + $0x1], 1 }

</bundles_post_ra>
